<compile_context>
chip_gen: v7x
topology: tpu7x:2x2x1
jax: 0.10.0
libtpu: 0.0.40
codegen_flags: <defaults>
</compile_context>

<pallas_src>
import functools

import jax
import jax.numpy as jnp
from jax.experimental import pallas as pl
from jax.experimental.pallas import tpu as pltpu


def _gcn_bn_kernel(x_ref, a_ref, thb_ref, gamma_ref, beta_ref, o_ref, *scratch,
                   bblk, inv_count, eps, persist_z):
    if persist_z:
        z_ref, sum_ref, sqsum_ref, scale_ref, shift_ref = scratch
    else:
        sum_ref, sqsum_ref, scale_ref, shift_ref = scratch

    n = a_ref.shape[0]
    tfo = thb_ref.shape[1]

    p = pl.program_id(0)       # 0 = stats pass, 1 = normalize/write pass
    bb = pl.program_id(1)      # batch-block index

    def _compute_z():
        # Graph convolution FIRST (contracts over nodes, T*Fin lanes wide),
        # then the block-diagonal Theta1 map on a (bblk*N)-row slab, then ReLU.
        a = a_ref[...]
        h = jnp.concatenate(
            [jnp.dot(a, x_ref[i], preferred_element_type=jnp.float32)
             for i in range(bblk)], axis=0)                       # (bblk*N, T*Fin)
        y = jnp.dot(h, thb_ref[...], preferred_element_type=jnp.float32)
        return jnp.maximum(y, 0.0).reshape(bblk, n, tfo)          # (bblk, N, T*Fout)

    @pl.when(jnp.logical_and(p == 0, bb == 0))
    def _init_stats():
        sum_ref[...] = jnp.zeros_like(sum_ref)
        sqsum_ref[...] = jnp.zeros_like(sqsum_ref)

    @pl.when(p == 0)
    def _stats_pass():
        z = _compute_z()
        if persist_z:
            z_ref[bb] = z
        for i in range(bblk):
            zi = z[i]                                             # (N, T*Fout)
            sum_ref[...] += jnp.sum(zi, axis=-1, keepdims=True)
            sqsum_ref[...] += jnp.sum(zi * zi, axis=-1, keepdims=True)

    @pl.when(jnp.logical_and(p == 1, bb == 0))
    def _finalize_stats():
        mean = sum_ref[...] * inv_count                           # (N, 1)
        var = sqsum_ref[...] * inv_count - mean * mean            # biased
        var = jnp.maximum(var, 0.0)                               # fp-cancel guard
        scale = gamma_ref[...] * jax.lax.rsqrt(var + eps)
        scale_ref[...] = scale
        shift_ref[...] = beta_ref[...] - mean * scale

    @pl.when(p == 1)
    def _normalize_and_write():
        z = z_ref[bb] if persist_z else _compute_z()
        o_ref[...] = z * scale_ref[...][None] + shift_ref[...][None]


def _pad_bytes(rows, cols, itemsize=4):
    # VMEM footprint of a (rows, cols) f32 tile after (8, 128) tiling.
    return ((rows + 7) // 8 * 8) * ((cols + 127) // 128 * 128) * itemsize


def gcn_block_forward(A_hat, X, theta, gamma, beta, eps=1e-5,
                      force_recompute=False, max_batch_block=None):
    B, N, T, Fin = X.shape
    Fout = theta.shape[1]
    tfi, tfo = T * Fin, T * Fout

    # Free (contiguous) reshape: (B, N, T, Fin) -> (B, N, T*Fin).
    x3d = X.reshape(B, N, tfi)
    # Block-diagonal Theta1: (T*Fin, T*Fout), theta repeated per timestep, so
    # (t,f)-interleaved lanes map to (t,o)-interleaved lanes in one lane-dense
    # dot.  (For production T*Fin > 128 a per-timestep RHS-stationary loop
    # would avoid the kron's zero FLOPs; at small T*Fin it is free.)
    theta_block = jnp.kron(jnp.eye(T, dtype=theta.dtype), theta)

    # ---- Per-generation VMEM budget (v7x 64 MiB vs v5e/v6e 128 MiB) --------
    budget = 40 * 1024 * 1024          # safe default on all generations
    try:
        cap = getattr(pltpu.get_tpu_info(), "vmem_capacity_bytes", None)
        if cap:
            budget = max(32 * 1024 * 1024, cap - 24 * 1024 * 1024)
    except Exception:
        pass

    # Persist the ReLU'd activations of pass 0 in VMEM when they fit: pass 1
    # then only normalizes + stores (no matmuls, no second HBM read of X).
    z_bytes = B * _pad_bytes(N, tfo)
    persist_z = (not force_recompute) and (z_bytes <= budget // 3)

    fixed = (2 * _pad_bytes(N, N)            # A_hat (resident)
             + 2 * _pad_bytes(tfi, tfo)      # theta_block (resident)
             + 4 * _pad_bytes(N, 1)          # gamma, beta
             + 4 * _pad_bytes(N, 1))         # sum / sqsum / scale / shift
    if persist_z:
        fixed += z_bytes

    def per_step(bb):
        # double-buffered X block + double-buffered output block
        return 2 * bb * (_pad_bytes(N, tfi) + _pad_bytes(N, tfo))

    # Largest divisor of B whose working set fits the budget; cap the per-step
    # row count so the unrolled per-batch graph-conv loop stays small.
    bmax = min(B, max(1, 512 // max(N, 1)))
    if max_batch_block is not None:
        bmax = min(bmax, max(1, max_batch_block))
    bblk = 1
    for cand in range(bmax, 0, -1):
        if B % cand == 0 and fixed + per_step(cand) <= budget:
            bblk = cand
            break
    num_bb = B // bblk

    kernel = functools.partial(_gcn_bn_kernel, bblk=bblk,
                               inv_count=1.0 / float(B * T * Fout),
                               eps=float(eps), persist_z=persist_z)

    if persist_z:
        # Pass 1 does not read X: park the window on the last block so no
        # extra X DMA is issued after the final pass-0 fetch.
        x_index_map = lambda p, b: (b + p * (num_bb - 1 - b), 0, 0)
    else:
        x_index_map = lambda p, b: (b, 0, 0)

    scratch = []
    if persist_z:
        scratch.append(pltpu.VMEM((num_bb, bblk, N, tfo), jnp.float32))
    scratch += [pltpu.VMEM((N, 1), jnp.float32) for _ in range(4)]

    out3d = pl.pallas_call(
        kernel,
        out_shape=jax.ShapeDtypeStruct((B, N, tfo), jnp.float32),
        grid_spec=pltpu.PrefetchScalarGridSpec(
            num_scalar_prefetch=0,
            grid=(2, num_bb),                                   # (pass, batch-block)
            in_specs=[
                pl.BlockSpec((bblk, N, tfi), x_index_map),              # X
                pl.BlockSpec((N, N), lambda p, b: (0, 0)),              # A_hat
                pl.BlockSpec((tfi, tfo), lambda p, b: (0, 0)),          # theta_block
                pl.BlockSpec((N, 1), lambda p, b: (0, 0)),              # gamma
                pl.BlockSpec((N, 1), lambda p, b: (0, 0)),              # beta
            ],
            # Pass 0 parks on output block 0 (never written, never flushed);
            # pass 1 walks the batch blocks writing lane-dense slabs.
            out_specs=pl.BlockSpec((bblk, N, tfo), lambda p, b: (b * p, 0, 0)),
            scratch_shapes=scratch,
        ),
        compiler_params=pltpu.CompilerParams(
            # Both axes carry sequential state (BN stat accumulation, then the
            # dependent normalize pass) -> "arbitrary".
            # TODO(synk): on v7x a leading 'parallel' node-block axis (tiling
            # A_hat rows / gamma / beta / stats) would split the per-node-exact
            # work across the two TensorCores.
            dimension_semantics=("arbitrary", "arbitrary"),
            vmem_limit_bytes=int(budget),
        ),
    )(x3d, A_hat, theta_block, gamma.reshape(N, 1), beta.reshape(N, 1))

    # Free reshape: (B, N, T*Fout) row-major == (B, N, T, Fout) row-major.
    return out3d.reshape(B, N, T, Fout)


def gcn_block_reference(A_hat, X, theta, gamma, beta, eps=1e-5):
    # Pure-JAX reference mirroring the PyTorch forward (training-mode BN).
    lfs = jnp.einsum('ij,bjtf->bitf', A_hat, X)
    t2 = jax.nn.relu(jnp.einsum('bitf,fo->bito', lfs, theta))
    mean = jnp.mean(t2, axis=(0, 2, 3), keepdims=True)
    var = jnp.mean((t2 - mean) ** 2, axis=(0, 2, 3), keepdims=True)
    return ((t2 - mean) / jnp.sqrt(var + eps)
            * gamma.reshape(1, -1, 1, 1) + beta.reshape(1, -1, 1, 1))


if __name__ == "__main__":
    B, N, T, Fin, Fout = 2, 8, 8, 4, 32

    key = jax.random.PRNGKey(0)
    k_adj, k_x, k_theta = jax.random.split(key, 3)

    # Deterministic normalized adjacency: D^{-1/2} (A + I) D^{-1/2}
    adj = (jax.random.uniform(k_adj, (N, N)) > 0.5).astype(jnp.float32)
    adj = jnp.maximum(adj, adj.T) + jnp.eye(N, dtype=jnp.float32)
    deg_inv_sqrt = 1.0 / jnp.sqrt(jnp.sum(adj, axis=1))
    A_hat = adj * deg_inv_sqrt[:, None] * deg_inv_sqrt[None, :]

    X = jax.random.normal(k_x, (B, N, T, Fin), dtype=jnp.float32)

    # Theta1 ~ U(-stdv, stdv), stdv = 1/sqrt(out_channels)  (reset_parameters)
    stdv = 1.0 / (Fout ** 0.5)
    theta = jax.random.uniform(k_theta, (Fin, Fout), minval=-stdv, maxval=stdv,
                               dtype=jnp.float32)
    # BatchNorm2d affine params at init.
    gamma = jnp.ones((N,), jnp.float32)
    beta = jnp.zeros((N,), jnp.float32)

    ref = gcn_block_reference(A_hat, X, theta, gamma, beta)

    # Default path: multi-batch block + persistent-z (pass 1 is store-only).
    out = jax.block_until_ready(gcn_block_forward(A_hat, X, theta, gamma, beta))
    assert out.shape == (B, N, T, Fout), out.shape
    assert jnp.allclose(out, ref, atol=1e-4, rtol=1e-4), \
        float(jnp.max(jnp.abs(out - ref)))

    # Recompute fallback + multi-block grid (the path huge shapes would take).
    out2 = jax.block_until_ready(
        gcn_block_forward(A_hat, X, theta, gamma, beta,
                          force_recompute=True, max_batch_block=1))
    assert jnp.allclose(out2, ref, atol=1e-4, rtol=1e-4), \
        float(jnp.max(jnp.abs(out2 - ref)))

    # Persistent-z with multiple batch blocks (dynamic z-scratch indexing).
    out3 = jax.block_until_ready(
        gcn_block_forward(A_hat, X, theta, gamma, beta, max_batch_block=1))
    assert jnp.allclose(out3, ref, atol=1e-4, rtol=1e-4), \
        float(jnp.max(jnp.abs(out3 - ref)))

    print("KERNEL_OK")
</pallas_src>

<mosaic_0001>
module attributes {stable_mosaic.version = 11 : i64} {
  func.func @_gcn_bn_kernel(%arg0: i32, %arg1: i32, %arg2: memref<2x8x32xf32, #tpu.memory_space<vmem>>, %arg3: memref<8x8xf32, #tpu.memory_space<vmem>>, %arg4: memref<32x256xf32, #tpu.memory_space<vmem>>, %arg5: memref<8x1xf32, #tpu.memory_space<vmem>>, %arg6: memref<8x1xf32, #tpu.memory_space<vmem>>, %arg7: memref<2x8x256xf32, #tpu.memory_space<vmem>>, %arg8: memref<1x2x8x256xf32, #tpu.memory_space<vmem>>, %arg9: memref<8x1xf32, #tpu.memory_space<vmem>>, %arg10: memref<8x1xf32, #tpu.memory_space<vmem>>, %arg11: memref<8x1xf32, #tpu.memory_space<vmem>>, %arg12: memref<8x1xf32, #tpu.memory_space<vmem>>) attributes {dimension_semantics = [#tpu.dimension_semantics<arbitrary>, #tpu.dimension_semantics<arbitrary>], iteration_bounds = array<i64: 2, 1>, scalar_prefetch = 0 : i64, scratch_operands = 5 : i64, tpu.core_type = #tpu.core_type<tc>, window_params = [{transform_indices = @transform_0, window_bounds = array<i64: 2, 8, 32>}, {pipeline_mode = #tpu.pipeline_mode<synchronous>, transform_indices = @transform_1, window_bounds = array<i64: 8, 8>}, {pipeline_mode = #tpu.pipeline_mode<synchronous>, transform_indices = @transform_2, window_bounds = array<i64: 32, 256>}, {pipeline_mode = #tpu.pipeline_mode<synchronous>, transform_indices = @transform_3, window_bounds = array<i64: 8, 1>}, {pipeline_mode = #tpu.pipeline_mode<synchronous>, transform_indices = @transform_4, window_bounds = array<i64: 8, 1>}, {transform_indices = @transform_5, window_bounds = array<i64: 2, 8, 256>}]} {
    %c0_i32 = arith.constant 0 : i32
    %0 = arith.cmpi eq, %arg0, %c0_i32 : i32
    %c0_i32_0 = arith.constant 0 : i32
    %1 = arith.cmpi eq, %arg1, %c0_i32_0 : i32
    %2 = arith.andi %0, %1 : i1
    %3 = arith.extui %2 : i1 to i32
    %c0_i32_1 = arith.constant 0 : i32
    %4 = arith.cmpi ne, %3, %c0_i32_1 : i32
    scf.if %4 {
      %cst = arith.constant 0.000000e+00 : f32
      %16 = vector.broadcast %cst : f32 to vector<8x1xf32>
      %c0 = arith.constant 0 : index
      %c0_8 = arith.constant 0 : index
      %17 = vector.load %arg9[%c0, %c0_8] : memref<8x1xf32, #tpu.memory_space<vmem>>, vector<8x1xf32>
      tpu.vector_store %arg9[%c0, %c0_8], %16 {strides = array<i32>} : memref<8x1xf32, #tpu.memory_space<vmem>>, vector<8x1xf32>,
      %cst_9 = arith.constant 0.000000e+00 : f32
      %18 = vector.broadcast %cst_9 : f32 to vector<8x1xf32>
      %c0_10 = arith.constant 0 : index
      %c0_11 = arith.constant 0 : index
      %19 = vector.load %arg10[%c0_10, %c0_11] : memref<8x1xf32, #tpu.memory_space<vmem>>, vector<8x1xf32>
      tpu.vector_store %arg10[%c0_10, %c0_11], %18 {strides = array<i32>} : memref<8x1xf32, #tpu.memory_space<vmem>>, vector<8x1xf32>,
    } else {
    }
    %c0_i32_2 = arith.constant 0 : i32
    %5 = arith.cmpi eq, %arg0, %c0_i32_2 : i32
    %6 = arith.extui %5 : i1 to i32
    %c0_i32_3 = arith.constant 0 : i32
    %7 = arith.cmpi ne, %6, %c0_i32_3 : i32
    scf.if %7 {
      %c0 = arith.constant 0 : index
      %c0_8 = arith.constant 0 : index
      %16 = vector.load %arg3[%c0, %c0_8] : memref<8x8xf32, #tpu.memory_space<vmem>>, vector<8x8xf32>
      %c0_9 = arith.constant 0 : index
      %c0_10 = arith.constant 0 : index
      %c0_11 = arith.constant 0 : index
      %17 = vector.load %arg2[%c0_9, %c0_10, %c0_11] : memref<2x8x32xf32, #tpu.memory_space<vmem>>, vector<1x8x32xf32>
      %18 = vector.shape_cast %17 : vector<1x8x32xf32> to vector<8x32xf32>
      %cst = arith.constant dense<0.000000e+00> : vector<8x32xf32>
      %19 = tpu.matmul %16, %18, %cst {dimension_numbers = #tpu.dot_dimension_numbers<[1], [0], [0], [1], [0, 0, 1, 1], [], []>} : vector<8x8xf32>, vector<8x32xf32>, vector<8x32xf32> -> vector<8x32xf32>
      %c1 = arith.constant 1 : index
      %c0_12 = arith.constant 0 : index
      %c0_13 = arith.constant 0 : index
      %20 = vector.load %arg2[%c1, %c0_12, %c0_13] : memref<2x8x32xf32, #tpu.memory_space<vmem>>, vector<1x8x32xf32>
      %21 = vector.shape_cast %20 : vector<1x8x32xf32> to vector<8x32xf32>
      %cst_14 = arith.constant dense<0.000000e+00> : vector<8x32xf32>
      %22 = tpu.matmul %16, %21, %cst_14 {dimension_numbers = #tpu.dot_dimension_numbers<[1], [0], [0], [1], [0, 0, 1, 1], [], []>} : vector<8x8xf32>, vector<8x32xf32>, vector<8x32xf32> -> vector<8x32xf32>
      %23 = tpu.concatenate %19, %22 in 0 : vector<8x32xf32>, vector<8x32xf32> -> vector<16x32xf32>
      %c0_15 = arith.constant 0 : index
      %c0_16 = arith.constant 0 : index
      %24 = vector.load %arg4[%c0_15, %c0_16] : memref<32x256xf32, #tpu.memory_space<vmem>>, vector<32x256xf32>
      %cst_17 = arith.constant dense<0.000000e+00> : vector<16x256xf32>
      %25 = tpu.matmul %23, %24, %cst_17 {dimension_numbers = #tpu.dot_dimension_numbers<[1], [0], [0], [1], [0, 0, 1, 1], [], []>} : vector<16x32xf32>, vector<32x256xf32>, vector<16x256xf32> -> vector<16x256xf32>
      %cst_18 = arith.constant 0.000000e+00 : f32
      %26 = vector.broadcast %cst_18 : f32 to vector<16x256xf32>
      %27 = arith.maximumf %25, %26 : vector<16x256xf32>
      %28 = vector.shape_cast %27 : vector<16x256xf32> to vector<2x8x256xf32>
      %29 = arith.index_cast %arg1 : i32 to index
      %c0_19 = arith.constant 0 : index
      %c0_20 = arith.constant 0 : index
      %c0_21 = arith.constant 0 : index
      %30 = vector.load %arg8[%29, %c0_19, %c0_20, %c0_21] : memref<1x2x8x256xf32, #tpu.memory_space<vmem>>, vector<1x2x8x256xf32>
      %31 = vector.shape_cast %30 : vector<1x2x8x256xf32> to vector<2x8x256xf32>
      %32 = vector.shape_cast %28 : vector<2x8x256xf32> to vector<1x2x8x256xf32>
      tpu.vector_store %arg8[%29, %c0_19, %c0_20, %c0_21], %32 {strides = array<i32>} : memref<1x2x8x256xf32, #tpu.memory_space<vmem>>, vector<1x2x8x256xf32>,
      %33 = vector.extract_strided_slice %28 {offsets = [0, 0, 0], sizes = [1, 8, 256], strides = [1, 1, 1]} : vector<2x8x256xf32> to vector<1x8x256xf32>
      %34 = vector.shape_cast %33 : vector<1x8x256xf32> to vector<8x256xf32>
      %c0_22 = arith.constant 0 : index
      %c0_23 = arith.constant 0 : index
      %35 = vector.load %arg9[%c0_22, %c0_23] : memref<8x1xf32, #tpu.memory_space<vmem>>, vector<8x1xf32>
      %cst_24 = arith.constant dense<0.000000e+00> : vector<8xf32>
      %36 = vector.multi_reduction <add>, %34, %cst_24 [1] : vector<8x256xf32> to vector<8xf32>
      %37 = vector.shape_cast %36 : vector<8xf32> to vector<8x1xf32>
      %38 = arith.addf %35, %37 : vector<8x1xf32>
      %c0_25 = arith.constant 0 : index
      %c0_26 = arith.constant 0 : index
      %39 = vector.load %arg9[%c0_25, %c0_26] : memref<8x1xf32, #tpu.memory_space<vmem>>, vector<8x1xf32>
      tpu.vector_store %arg9[%c0_25, %c0_26], %38 {strides = array<i32>} : memref<8x1xf32, #tpu.memory_space<vmem>>, vector<8x1xf32>,
      %c0_27 = arith.constant 0 : index
      %c0_28 = arith.constant 0 : index
      %40 = vector.load %arg10[%c0_27, %c0_28] : memref<8x1xf32, #tpu.memory_space<vmem>>, vector<8x1xf32>
      %41 = arith.mulf %34, %34 : vector<8x256xf32>
      %cst_29 = arith.constant dense<0.000000e+00> : vector<8xf32>
      %42 = vector.multi_reduction <add>, %41, %cst_29 [1] : vector<8x256xf32> to vector<8xf32>
      %43 = vector.shape_cast %42 : vector<8xf32> to vector<8x1xf32>
      %44 = arith.addf %40, %43 : vector<8x1xf32>
      %c0_30 = arith.constant 0 : index
      %c0_31 = arith.constant 0 : index
      %45 = vector.load %arg10[%c0_30, %c0_31] : memref<8x1xf32, #tpu.memory_space<vmem>>, vector<8x1xf32>
      tpu.vector_store %arg10[%c0_30, %c0_31], %44 {strides = array<i32>} : memref<8x1xf32, #tpu.memory_space<vmem>>, vector<8x1xf32>,
      %46 = vector.extract_strided_slice %28 {offsets = [1, 0, 0], sizes = [1, 8, 256], strides = [1, 1, 1]} : vector<2x8x256xf32> to vector<1x8x256xf32>
      %47 = vector.shape_cast %46 : vector<1x8x256xf32> to vector<8x256xf32>
      %c0_32 = arith.constant 0 : index
      %c0_33 = arith.constant 0 : index
      %48 = vector.load %arg9[%c0_32, %c0_33] : memref<8x1xf32, #tpu.memory_space<vmem>>, vector<8x1xf32>
      %cst_34 = arith.constant dense<0.000000e+00> : vector<8xf32>
      %49 = vector.multi_reduction <add>, %47, %cst_34 [1] : vector<8x256xf32> to vector<8xf32>
      %50 = vector.shape_cast %49 : vector<8xf32> to vector<8x1xf32>
      %51 = arith.addf %48, %50 : vector<8x1xf32>
      %c0_35 = arith.constant 0 : index
      %c0_36 = arith.constant 0 : index
      %52 = vector.load %arg9[%c0_35, %c0_36] : memref<8x1xf32, #tpu.memory_space<vmem>>, vector<8x1xf32>
      tpu.vector_store %arg9[%c0_35, %c0_36], %51 {strides = array<i32>} : memref<8x1xf32, #tpu.memory_space<vmem>>, vector<8x1xf32>,
      %c0_37 = arith.constant 0 : index
      %c0_38 = arith.constant 0 : index
      %53 = vector.load %arg10[%c0_37, %c0_38] : memref<8x1xf32, #tpu.memory_space<vmem>>, vector<8x1xf32>
      %54 = arith.mulf %47, %47 : vector<8x256xf32>
      %cst_39 = arith.constant dense<0.000000e+00> : vector<8xf32>
      %55 = vector.multi_reduction <add>, %54, %cst_39 [1] : vector<8x256xf32> to vector<8xf32>
      %56 = vector.shape_cast %55 : vector<8xf32> to vector<8x1xf32>
      %57 = arith.addf %53, %56 : vector<8x1xf32>
      %c0_40 = arith.constant 0 : index
      %c0_41 = arith.constant 0 : index
      %58 = vector.load %arg10[%c0_40, %c0_41] : memref<8x1xf32, #tpu.memory_space<vmem>>, vector<8x1xf32>
      tpu.vector_store %arg10[%c0_40, %c0_41], %57 {strides = array<i32>} : memref<8x1xf32, #tpu.memory_space<vmem>>, vector<8x1xf32>,
    } else {
    }
    %c1_i32 = arith.constant 1 : i32
    %8 = arith.cmpi eq, %arg0, %c1_i32 : i32
    %c0_i32_4 = arith.constant 0 : i32
    %9 = arith.cmpi eq, %arg1, %c0_i32_4 : i32
    %10 = arith.andi %8, %9 : i1
    %11 = arith.extui %10 : i1 to i32
    %c0_i32_5 = arith.constant 0 : i32
    %12 = arith.cmpi ne, %11, %c0_i32_5 : i32
    scf.if %12 {
      %c0 = arith.constant 0 : index
      %c0_8 = arith.constant 0 : index
      %16 = vector.load %arg9[%c0, %c0_8] : memref<8x1xf32, #tpu.memory_space<vmem>>, vector<8x1xf32>
      %cst = arith.constant 0.001953125 : f32
      %17 = vector.broadcast %cst : f32 to vector<8x1xf32>
      %18 = arith.mulf %16, %17 : vector<8x1xf32>
      %c0_9 = arith.constant 0 : index
      %c0_10 = arith.constant 0 : index
      %19 = vector.load %arg10[%c0_9, %c0_10] : memref<8x1xf32, #tpu.memory_space<vmem>>, vector<8x1xf32>
      %cst_11 = arith.constant 0.001953125 : f32
      %20 = vector.broadcast %cst_11 : f32 to vector<8x1xf32>
      %21 = arith.mulf %19, %20 : vector<8x1xf32>
      %22 = arith.mulf %18, %18 : vector<8x1xf32>
      %23 = arith.subf %21, %22 : vector<8x1xf32>
      %cst_12 = arith.constant 0.000000e+00 : f32
      %24 = vector.broadcast %cst_12 : f32 to vector<8x1xf32>
      %25 = arith.maximumf %23, %24 : vector<8x1xf32>
      %c0_13 = arith.constant 0 : index
      %c0_14 = arith.constant 0 : index
      %26 = vector.load %arg5[%c0_13, %c0_14] : memref<8x1xf32, #tpu.memory_space<vmem>>, vector<8x1xf32>
      %cst_15 = arith.constant 9.99999974E-6 : f32
      %27 = vector.broadcast %cst_15 : f32 to vector<8x1xf32>
      %28 = arith.addf %25, %27 : vector<8x1xf32>
      %29 = math.rsqrt %28 : vector<8x1xf32>
      %30 = arith.mulf %26, %29 : vector<8x1xf32>
      %c0_16 = arith.constant 0 : index
      %c0_17 = arith.constant 0 : index
      %31 = vector.load %arg11[%c0_16, %c0_17] : memref<8x1xf32, #tpu.memory_space<vmem>>, vector<8x1xf32>
      tpu.vector_store %arg11[%c0_16, %c0_17], %30 {strides = array<i32>} : memref<8x1xf32, #tpu.memory_space<vmem>>, vector<8x1xf32>,
      %c0_18 = arith.constant 0 : index
      %c0_19 = arith.constant 0 : index
      %32 = vector.load %arg6[%c0_18, %c0_19] : memref<8x1xf32, #tpu.memory_space<vmem>>, vector<8x1xf32>
      %33 = arith.mulf %18, %30 : vector<8x1xf32>
      %34 = arith.subf %32, %33 : vector<8x1xf32>
      %c0_20 = arith.constant 0 : index
      %c0_21 = arith.constant 0 : index
      %35 = vector.load %arg12[%c0_20, %c0_21] : memref<8x1xf32, #tpu.memory_space<vmem>>, vector<8x1xf32>
      tpu.vector_store %arg12[%c0_20, %c0_21], %34 {strides = array<i32>} : memref<8x1xf32, #tpu.memory_space<vmem>>, vector<8x1xf32>,
    } else {
    }
    %c1_i32_6 = arith.constant 1 : i32
    %13 = arith.cmpi eq, %arg0, %c1_i32_6 : i32
    %14 = arith.extui %13 : i1 to i32
    %c0_i32_7 = arith.constant 0 : i32
    %15 = arith.cmpi ne, %14, %c0_i32_7 : i32
    scf.if %15 {
      %16 = arith.index_cast %arg1 : i32 to index
      %c0 = arith.constant 0 : index
      %c0_8 = arith.constant 0 : index
      %c0_9 = arith.constant 0 : index
      %17 = vector.load %arg8[%16, %c0, %c0_8, %c0_9] : memref<1x2x8x256xf32, #tpu.memory_space<vmem>>, vector<1x2x8x256xf32>
      %18 = vector.shape_cast %17 : vector<1x2x8x256xf32> to vector<2x8x256xf32>
      %c0_10 = arith.constant 0 : index
      %c0_11 = arith.constant 0 : index
      %19 = vector.load %arg11[%c0_10, %c0_11] : memref<8x1xf32, #tpu.memory_space<vmem>>, vector<8x1xf32>
      %20 = vector.shape_cast %19 : vector<8x1xf32> to vector<1x8x1xf32>
      %21 = vector.broadcast %20 : vector<1x8x1xf32> to vector<2x8x256xf32>
      %22 = arith.mulf %18, %21 : vector<2x8x256xf32>
      %c0_12 = arith.constant 0 : index
      %c0_13 = arith.constant 0 : index
      %23 = vector.load %arg12[%c0_12, %c0_13] : memref<8x1xf32, #tpu.memory_space<vmem>>, vector<8x1xf32>
      %24 = vector.shape_cast %23 : vector<8x1xf32> to vector<1x8x1xf32>
      %25 = vector.broadcast %24 : vector<1x8x1xf32> to vector<2x8x256xf32>
      %26 = arith.addf %22, %25 : vector<2x8x256xf32>
      %c0_14 = arith.constant 0 : index
      %c0_15 = arith.constant 0 : index
      %c0_16 = arith.constant 0 : index
      %27 = vector.load %arg7[%c0_14, %c0_15, %c0_16] : memref<2x8x256xf32, #tpu.memory_space<vmem>>, vector<2x8x256xf32>
      tpu.vector_store %arg7[%c0_14, %c0_15, %c0_16], %26 {strides = array<i32>} : memref<2x8x256xf32, #tpu.memory_space<vmem>>, vector<2x8x256xf32>,
    } else {
    }
    return
  }
  func.func @transform_0(%arg0: i32, %arg1: i32) -> (i32, i32, i32) {
    %c0_i32 = arith.constant 0 : i32
    %0 = arith.subi %c0_i32, %arg1 : i32
    %1 = arith.muli %arg0, %0 : i32
    %2 = arith.addi %arg1, %1 : i32
    %c0_i32_0 = arith.constant 0 : i32
    %c0_i32_1 = arith.constant 0 : i32
    %c0_i32_2 = arith.constant 0 : i32
    return %2, %c0_i32_0, %c0_i32_1 : i32, i32, i32
  }
  func.func @transform_1(%arg0: i32, %arg1: i32) -> (i32, i32) {
    %c0_i32 = arith.constant 0 : i32
    %c0_i32_0 = arith.constant 0 : i32
    %c0_i32_1 = arith.constant 0 : i32
    return %c0_i32, %c0_i32_0 : i32, i32
  }
  func.func @transform_2(%arg0: i32, %arg1: i32) -> (i32, i32) {
    %c0_i32 = arith.constant 0 : i32
    %c0_i32_0 = arith.constant 0 : i32
    %c0_i32_1 = arith.constant 0 : i32
    return %c0_i32, %c0_i32_0 : i32, i32
  }
  func.func @transform_3(%arg0: i32, %arg1: i32) -> (i32, i32) {
    %c0_i32 = arith.constant 0 : i32
    %c0_i32_0 = arith.constant 0 : i32
    %c0_i32_1 = arith.constant 0 : i32
    return %c0_i32, %c0_i32_0 : i32, i32
  }
  func.func @transform_4(%arg0: i32, %arg1: i32) -> (i32, i32) {
    %c0_i32 = arith.constant 0 : i32
    %c0_i32_0 = arith.constant 0 : i32
    %c0_i32_1 = arith.constant 0 : i32
    return %c0_i32, %c0_i32_0 : i32, i32
  }
  func.func @transform_5(%arg0: i32, %arg1: i32) -> (i32, i32, i32) {
    %0 = arith.muli %arg1, %arg0 : i32
    %c0_i32 = arith.constant 0 : i32
    %c0_i32_0 = arith.constant 0 : i32
    %c0_i32_1 = arith.constant 0 : i32
    return %0, %c0_i32, %c0_i32_0 : i32, i32, i32
  }
}

</mosaic_0001>

<bundles_post_ra>
// kernel: tpu_custom_call.1
= control target key start
LH: loop header
LB: loop body
LE: loop exit
PB: predicated region body
PF: predicated region fallthrough
CT: control target
= control target key end

     0   :  { %10 = vsyncpa [#allocation8], 0  ;;  %s1183_s0 = inlined_call_operand.vmem [shape: f32[2,8,32], index: 0, kind: input, shape index: {}]   ;;  %s1184_s1 = inlined_call_operand.hbm [shape: f32[8,8], index: 1, kind: input, shape index: {}]   ;;  %s1185_s2 = inlined_call_operand.hbm [shape: f32[32,256], index: 2, kind: input, shape index: {}]   ;;  %s1186_s3 = inlined_call_operand.vmem [shape: f32[8,1], index: 3, kind: input, shape index: {}]   ;;  %s1187_s4 = inlined_call_operand.vmem [shape: f32[8,1], index: 4, kind: input, shape index: {}]   ;;  %s1188_s5 = inlined_call_operand.hbm [shape: f32[2,8,256], index: 5, kind: output, shape index: {}]  }
   0x1   :  { %11 = vsyncpa [#allocation11], 0 }
   0x2   :  { %12 = vsyncpa [#allocation9], 0 }
   0x3   :  { %14 = vsyncpa [#allocation9 + $0x1], 0  ;;  %s1028_s18 = smov 0   ;;  %s1030_s19 = smov 0  }
   0x4   :  { %s1032_s20 = smov 0  }
   0x5 LB: > { %s750_s21 = sadd.s32 4294967295, %s985_s20   ;;  %s751_s22 = sadd.s32 4294967294, %s985_s20   ;;  %s985_s20 = sphi %s1032_s20, %s20_s20   ;;  %s981_s19 = sphi %s1030_s19, %s1199_s19   ;;  %s977_s18 = sphi %s1028_s18, %s1198_s18  }
   0x6   : > { %s32_s23 = sadd.s32 1, %s981_s19  ;;  %p752_p0 = scmp.ge.s32.totalorder %s985_s20, 1 }
   0x7   : > { %p34_p1 = scmp.ge.s32.totalorder %s32_s23, 2  ;;  %p181_p2 = scmp.lt.s32.totalorder %s985_s20, 3 }
   0x8   : > { %p1050_p3 = scmp.eq.s32.totalorder %s750_s21, 0  ;;  %s987_s26 = smov [#allocation7]  }
   0x9   : > { %s1201_s23 = smov (%p34_p1, %s32_s23), 0  ;;  %p1056_p4 = pnand %p752_p0, %p181_p2 }
   0xa   : > { %s1192_s24 = scalar_select %p1050_p3, 1, 0 }
   0xb   : > { %s1193_s25 = scalar_select %p1056_p4, 1, 0 }
   0xc   : > { %s194_s27 = sshll.u32 %s987_s26, 4  ;;  %p813_p5 = pneg %p1056_p4  ;;  %s195_s27 = int_to_ptr.vmem [resolvable:$true] %s194_s27 }
   0xd   : > { %s988_s28 = smov [#allocation10]   ;;  %s869_s8 = scalar_lea.hbm %s1184_s1, 128 }
   0xe   : > { %s204_s29 = sshll.u32 %s988_s28, 4  ;;  %p1064_p6 = pnand %p1050_p3, %p813_p5  ;;  %s1068_s29 = int_to_ptr.vmem [resolvable:$true] %s204_s29 }
   0xf   : > { %p870_p7 = scmp.ne.s32.totalorder %s1184_s1, %s869_s8  ;;  %p876_p11 = scmp.lt.u32.totalorder %s869_s8, %s1184_s1 }
  0x10   : > { %p871_p8 = pneg %p1064_p6 }
  0x12   : > { %p872_p9 = pnand %p871_p8, %p870_p7 }
  0x14   : > { %p873_p10 = pneg %p872_p9 }
  0x16   : > { %p878_p12 = pnand %p876_p11, %p873_p10 }
  0x18   : > { %881 = shalt.err (!%p878_p12)
}
  0x19   : > { %s882_s13 = scalar_lea.vmem %s195_s27, 128  ;;  %p890_p2 = scmp.lt.s32.totalorder %s195_s27, %s195_s27 }
  0x1a   : > { %p883_p13 = scmp.ne.s32.totalorder %s195_s27, %s882_s13  ;;  %p891_p5 = scmp.lt.s32.totalorder %s882_s13, %s882_s13 }
  0x1c   : > { %p885_p0 = pnand %p883_p13, %p871_p8  ;;  %p892_p3 = por %p891_p5, %p890_p2 }
  0x1e   : > { %p886_p1 = pneg %p885_p0 }
  0x20   : > { %p893_p4 = pnand %p892_p3, %p886_p1 }
  0x22   : > { %896 = shalt.err (!%p893_p4)
}
  0x23   : > { %816 = dma.hbm_to_vmem [thread:$0]  (!%p1064_p6), %s1184_s1, 128, %s195_s27, [#allocation8]  }
  0x24   : > { %s897_s26 = scalar_lea.hbm %s1185_s2, 1024 }
  0x25   : > { %p898_p7 = scmp.ne.s32.totalorder %s1185_s2, %s897_s26  ;;  %p904_p4 = scmp.lt.u32.totalorder %s897_s26, %s1185_s2 }
  0x27   : > { %p900_p9 = pnand %p898_p7, %p871_p8 }
  0x29   : > { %p901_p3 = pneg %p900_p9 }
  0x2b   : > { %p906_p10 = pnand %p904_p4, %p901_p3 }
  0x2d   : > { %909 = shalt.err (!%p906_p10)
}
  0x2e   : > { %s910_s27 = scalar_lea.vmem %s1068_s29, 1024  ;;  %p918_p0 = scmp.lt.s32.totalorder %s1068_s29, %s1068_s29 }
  0x2f   : > { %p911_p11 = scmp.ne.s32.totalorder %s1068_s29, %s910_s27  ;;  %p919_p1 = scmp.lt.s32.totalorder %s910_s27, %s910_s27 }
  0x31   : > { %p913_p12 = pnand %p911_p11, %p871_p8  ;;  %p920_p2 = por %p919_p1, %p918_p0 }
  0x33   : > { %p914_p13 = pneg %p913_p12 }
  0x35   : > { %p921_p5 = pnand %p920_p2, %p914_p13 }
  0x37   : > { %924 = shalt.err (!%p921_p5)
}
  0x38   : > { %s989_s9 = smov 256   ;;  %s990_s10 = smov 16  }
  0x39   : > { %819 = dma.hbm_to_vmem [thread:$0]  (!%p1064_p6), %s1185_s2, 1024, %s1068_s29, [#allocation11], %s989_s9, %s989_s9, %s990_s10  }
  0x3a   : > { %p1195_p7 = scmp.ne.s32.totalorder %s1193_s25, 0 }
  0x3b   : > { %p1196_p8 = scmp.ne.s32.totalorder (!%p1195_p7), %s1192_s24, 0 }
  0x3c   : > { %241 = sbr.rel (%p1195_p7) target bundleno = 867 (0x363), region = 40 }
  0x43   : > { %964 = dma.done.wait (%p1196_p8), [#allocation8], 128  }
  0x44   : > { %966 = vsyncadd (%p1196_p8), [#allocation8], 4294967168 }
  0x45   : > { %968 = dma.done.wait (%p1196_p8), [#allocation11], 1024  }
  0x46   : > { %970 = vsyncadd (%p1196_p8), [#allocation11], 4294966272  ;;  %p290_p9 = scmp.eq.s32.totalorder %s977_s18, 0 }
  0x47   : > { %vm296_vm0 = vcmask (%p290_p9), 7168   ;;  %v991_v0 = vmov (%p290_p9), 0.0  }
  0x48   : > { %295 = sbr.rel (!%p290_p9) target bundleno = 79 (0x4f), region = 52  ;;  %297 = vst.msk [vmem:[#allocation3] sm:$0xff] (%p290_p9), %vm296_vm0, %v991_v0  ;;  %298 = vst.msk [vmem:[#allocation4] sm:$0xff] (%p290_p9), %vm296_vm0, %v991_v0 }
  0x4f PF: > { %p761_p6 = scmp.ne.s32.totalorder %s977_s18, 0 }
  0x50   : > { %v303_v1 = vld [vmem:[%s1183_s0] sm:$0xff] (!%p761_p6)  ;;  %vm304_vm1 = vcmask (!%p761_p6), 64512   ;;  %v763_v3 = vld [vmem:[%s1183_s0 + $0x8] sm:$0xff] (!%p761_p6)  ;;  %v992_v4 = vmov (!%p761_p6), 0.0   ;;  %vm993_vm2 = vmmov (!%p761_p6), 0   ;;  %v451_v5 = vld [vmem:[#allocation10 + $0x8] sm:$0xff] (!%p761_p6) }
  0x51   : > { %301 = sbr.rel (%p761_p6) target bundleno = 671 (0x29f), region = 56  ;;  %v302_v2 = vld [vmem:[#allocation7] sm:$0xff] (!%p761_p6)  ;;  %779 = vmatprep.subr.mxu0 (!%p761_p6), %v992_v4  ;;  %781 = vmatprep.mubr.msk.f32.mxu0 (!%p761_p6), %vm993_vm2, %v992_v4  ;;  %v450_v7 = vld [vmem:[#allocation10] sm:$0xff] (!%p761_p6)  ;;  %v452_v9 = vld [vmem:[#allocation10 + $0x10] sm:$0xff] (!%p761_p6)  ;;  %vm458_vm3 = vcmask (!%p761_p6), 261120   ;;  %vm558_vm4 = vcmask (!%p761_p6), 7168  }
  0x52   : > { %v453_v6 = vld [vmem:[#allocation10 + $0x18] sm:$0xff] (!%p761_p6)  ;;  %780 = vmatpush3.msra.mxu0 (!%p761_p6), %v303_v1  ;;  %784 = vmatprep.subr.mxu1 (!%p761_p6), %v992_v4  ;;  %v455_v10 = vld [vmem:[#allocation10 + $0x28] sm:$0xff] (!%p761_p6)  ;;  %v791_v12 = vpack.c.bf16 (!%p761_p6), %v452_v9, %v450_v7  ;;  %v454_v14 = vld [vmem:[#allocation10 + $0x20] sm:$0xff] (!%p761_p6) }
  0x53   : > { %v789_v8 = vpack.c.bf16 (!%p761_p6), %v453_v6, %v451_v5  ;;  %v457_v11 = vld [vmem:[#allocation10 + $0x38] sm:$0xff] (!%p761_p6)  ;;  %782 = vmatmul.mubr.msk.f32.vlgmr.msra.gmra.mrb[0].mxu0 (!%p761_p6), %vm304_vm1, %v302_v2  ;;  %785 = vmatpush3.msra.mxu1 (!%p761_p6), %v763_v3  ;;  %v456_v15 = vld [vmem:[#allocation10 + $0x30] sm:$0xff] (!%p761_p6)  ;;  %v560_v40 = vld [vmem:[#allocation4] sm:$0xff] (!%p761_p6) }
  0x54   : > { %v793_v13 = vpack.c.bf16 (!%p761_p6), %v457_v11, %v455_v10  ;;  %786 = vmatprep.mubr.msk.f32.mxu1 (!%p761_p6), %vm993_vm2, %v992_v4  ;;  %v795_v16 = vpack.c.bf16 (!%p761_p6), %v456_v15, %v454_v14  ;;  %529 = vmatprep.mubr.f32.mxu0 (!%p761_p6), %v992_v4  ;;  %v553_v37 = vld [vmem:[#allocation3] sm:$0xff] (!%p761_p6) }
  0x55   : > { %790 = vmatprep.subr.bf16.mxu0 (!%p761_p6), %v789_v8  ;;  %787 = vmatmul.mubr.msk.f32.vlgmr.msra.gmra.mrb[0].mxu1 (!%p761_p6), %vm304_vm1, %v302_v2 }
  0x56   : > { %792 = vmatpush1.bf16.msra.mxu0 (!%p761_p6), %v791_v12  ;;  %797 = vmatprep.subr.bf16.mxu1 (!%p761_p6), %v789_v8 }
  0x57   : > { %794 = vmatprep.subr.bf16.mxu0 (!%p761_p6), %v793_v13  ;;  %799 = vmatpush1.bf16.msra.mxu1 (!%p761_p6), %v791_v12 }
  0x58   : > { %798 = vmatprep.subr.bf16.mxu1 %v793_v13  ;;  %535 = vmatprep.mubr.f32.mxu1 %v992_v4 }
  0x5a   : > { %796 = vmatpush1.bf16.msra.mxu0 %v795_v16 }
  0x5b   : > { %800 = vmatpush1.bf16.msra.mxu1 %v795_v16 }
 0x126   : > { %v374_v17 = vpop.f32.mrb[0].mxu0 }
 0x127   : > { %v783_v18 = vpop.f32.mrb[1].mxu0  ;;  %765 = vmatmul.mubr.msk.f32.vlgmr.msra.gmra.mrb[2].mxu0 %vm458_vm3, %v374_v17 }
 0x128   : > { %v446_v19 = vpop.f32.mrb[0].mxu1 }
 0x129   : > { %766 = vmatmul.mubr.msk.f32.vlgmr.msra.gmra.mrb[2].mxu1 %vm458_vm3, %v446_v19  ;;  %v788_v20 = vpop.f32.mrb[1].mxu1 }
 0x1fa   : > { %v531_v21 = vpop.f32.mrb[2].mxu0 }
 0x1fb   : > { %v542_v22 = vmax.f32 %v531_v21, 0.0  ;;  %v533_v23 = vpop.f32.mrb[3].mxu0 }
 0x1fc   : > { %v543_v24 = vmax.f32 %v533_v23, 0.0  ;;  %v537_v25 = vpop.f32.mrb[2].mxu1 }
 0x1fd   : > { %549 = vst [vmem:[#allocation2] sm:$0xff] %v542_v22  ;;  %v544_v26 = vmax.f32 %v537_v25, 0.0  ;;  %v539_v27 = vpop.f32.mrb[3].mxu1  ;;  %v561_v28 = vmul.f32 %v542_v22, %v542_v22 }
 0x1fe   : > { %550 = vst [vmem:[#allocation2 + $0x8] sm:$0xff] %v543_v24  ;;  %v554_v29 = vadd.f32 %v543_v24, %v542_v22  ;;  %v545_v30 = vmax.f32 %v539_v27, 0.0  ;;  %v562_v31 = vmul.f32 %v543_v24, %v543_v24 }
 0x1ff   : > { %551 = vst [vmem:[#allocation2 + $0x10] sm:$0xff] %v544_v26  ;;  %v575_v32 = vmul.f32 %v544_v26, %v544_v26 }
 0x200   : > { %555 = vadd.xlane.f32.xlu0 %v554_v29  ;;  %552 = vst [vmem:[#allocation2 + $0x18] sm:$0xff] %v545_v30  ;;  %v563_v33 = vadd.f32 %v562_v31, %v561_v28  ;;  %v569_v34 = vadd.f32 %v545_v30, %v544_v26  ;;  %v576_v35 = vmul.f32 %v545_v30, %v545_v30 }
 0x202   : > { %570 = vadd.xlane.f32.xlu1 %v569_v34  ;;  %v577_v36 = vadd.f32 %v576_v35, %v575_v32 }
 0x204   : > { %564 = vadd.xlane.f32.xlu0 %v563_v33 }
 0x206   : > { %578 = vadd.xlane.f32.xlu1 %v577_v36 }
 0x28d   : > { %v556_v38 = vpop.xlane.xlu0 %555 }
 0x28e   : > { %v557_v39 = vadd.f32 %v556_v38, %v553_v37 }
 0x28f   : > { %v571_v43 = vpop.xlane.xlu1 %570 }
 0x290   : > { %559 = vst.msk [vmem:[#allocation3] sm:$0xff] %vm558_vm4, %v557_v39 }
 0x291   : > { %v565_v41 = vpop.xlane.xlu0 %564 }
 0x292   : > { %v566_v42 = vadd.f32 %v565_v41, %v560_v40 }
 0x293   : > { %v579_v46 = vpop.xlane.xlu1 %578 }
 0x294   : > { %567 = vst.msk [vmem:[#allocation4] sm:$0xff] %vm558_vm4, %v566_v42 }
 0x297   : > { %v568_v44 = vld [vmem:[#allocation3] sm:$0xff] }
 0x298   : > { %v572_v45 = vadd.f32 %v571_v43, %v568_v44 }
 0x29a   : > { %573 = vst.msk [vmem:[#allocation3] sm:$0xff] %vm558_vm4, %v572_v45 }
 0x29b   : > { %v574_v47 = vld [vmem:[#allocation4] sm:$0xff] }
 0x29c   : > { %v580_v48 = vadd.f32 %v579_v46, %v574_v47 }
 0x29e   : > { %581 = vst.msk [vmem:[#allocation4] sm:$0xff] %vm558_vm4, %v580_v48 }
 0x29f PF: > { %p582_p3 = scmp.eq.s32.totalorder %s977_s18, 1 }
 0x2a0   : > { %v594_v57 = vld [vmem:[%s1186_s3] sm:$0xff] (%p582_p3)  ;;  %vm598_vm5 = vcmask (%p582_p3), 7168  }
 0x2a1   : > { %586 = sbr.rel (!%p582_p3) target bundleno = 704 (0x2c0), region = 60  ;;  %v587_v49 = vld [vmem:[#allocation3] sm:$0xff] (%p582_p3) }
 0x2a2   : > { %v588_v51 = vmul.f32 (%p582_p3), 0.001953125, %v587_v49  ;;  %v600_v60 = vld [vmem:[%s1187_s4] sm:$0xff] (%p582_p3) }
 0x2a4   : > { %v591_v53 = vmul.f32 (%p582_p3), %v588_v51, %v588_v51 }
 0x2a5   : > { %v589_v50 = vld [vmem:[#allocation4] sm:$0xff] (%p582_p3) }
 0x2a6   : > { %v590_v52 = vmul.f32 (%p582_p3), 0.001953125, %v589_v50 }
 0x2a8   : > { %v592_v54 = vsub.f32 %v590_v52, %v591_v53 }
 0x2aa   : > { %v593_v55 = vmax.f32 %v592_v54, 0.0 }
 0x2ac   : > { %v595_v56 = vadd.f32 1e-05, %v593_v55 }
 0x2ae   : > { %866 = vrsqrt.f32 %v595_v56 }
 0x2b8   : > { %v867_v58 = vpop.eup %866 }
 0x2b9   : > { %v597_v59 = vmul.f32 %v867_v58, %v594_v57 }
 0x2bb   : > { %599 = vst.msk [vmem:[#allocation5] sm:$0xff] %vm598_vm5, %v597_v59  ;;  %v601_v61 = vmul.f32 %v597_v59, %v588_v51 }
 0x2bd   : > { %v602_v62 = vsub.f32 %v600_v60, %v601_v61 }
 0x2bf   : > { %603 = vst.msk [vmem:[#allocation6] sm:$0xff] %vm598_vm5, %v602_v62 }
 0x2c0 PF: > { %p768_p4 = scmp.ne.s32.totalorder %s977_s18, 1 }
 0x2c1   : > { %v994_v0 = vmov (!%p768_p4), 0   ;;  %v610_v2 = vld [vmem:[#allocation2] sm:$0xff] (!%p768_p4)  ;;  %v611_v4 = vld [vmem:[#allocation2 + $0x8] sm:$0xff] (!%p768_p4)  ;;  %v612_v5 = vld [vmem:[#allocation2 + $0x10] sm:$0xff] (!%p768_p4) }
 0x2c2   : > { %606 = sbr.rel (%p768_p4) target bundleno = 843 (0x34b), region = 64  ;;  %v614_v63 = vld [vmem:[#allocation5] sm:$0xff] (!%p768_p4)  ;;  %868 = vset.pattern.permute.xlu0 (!%p768_p4), %v994_v0  ;;  %v613_v6 = vld [vmem:[#allocation2 + $0x18] sm:$0xff] (!%p768_p4) }
 0x2c3   : > { %617 = vperm.xlu0 (!%p768_p4), %868, %v614_v63  }
 0x2c6   : > { %v624_v1 = vld [vmem:[#allocation6] sm:$0xff] (!%p768_p4) }
 0x2c7   : > { %627 = vperm.xlu0 (!%p768_p4), %868, %v624_v1  }
 0x342   : > { %v618_v3 = vpop.permute.xlu0 %617 }
 0x343   : > { %v620_v7 = vmul.f32 %v618_v3, %v610_v2  ;;  %v621_v8 = vmul.f32 %v618_v3, %v611_v4  ;;  %v622_v9 = vmul.f32 %v618_v3, %v612_v5  ;;  %v623_v10 = vmul.f32 %v618_v3, %v613_v6 }
 0x346   : > { %v628_v11 = vpop.permute.xlu0 %627 }
 0x347   : > { %v630_v12 = vadd.f32 %v628_v11, %v620_v7  ;;  %v631_v13 = vadd.f32 %v628_v11, %v621_v8  ;;  %v632_v14 = vadd.f32 %v628_v11, %v622_v9  ;;  %v633_v15 = vadd.f32 %v628_v11, %v623_v10 }
 0x349   : > { %634 = vst [vmem:[#allocation12] sm:$0xff] %v630_v12  ;;  %635 = vst [vmem:[#allocation12 + $0x8] sm:$0xff] %v631_v13 }
 0x34a   : > { %636 = vst [vmem:[#allocation12 + $0x10] sm:$0xff] %v632_v14  ;;  %637 = vst [vmem:[#allocation12 + $0x18] sm:$0xff] %v633_v15 }
 0x34b PF: > { %p1149_p10 = scmp.eq.s32.totalorder %s750_s21, 1  ;;  %s995_s17 = smov [#allocation12]  }
 0x34c   : > { %s654_s26 = sshll.u32 %s995_s17, 4  ;;  %s655_s26 = int_to_ptr.vmem [resolvable:$true] %s654_s26 }
 0x34d   : > { %s925_s28 = scalar_lea.vmem %s655_s26, 512  ;;  %s931_s6 = scalar_lea.vmem %s655_s26, 1024 }
 0x34e   : > { %p926_p11 = scmp.ne.s32.totalorder %s655_s26, %s925_s28  ;;  %p932_p0 = scmp.lt.s32.totalorder %s655_s26, %s655_s26 }
 0x34f   : > { %p933_p1 = scmp.lt.s32.totalorder %s931_s6, %s925_s28 }
 0x350   : > { %p927_p12 = pnand %p926_p11, %p1149_p10 }
 0x351   : > { %p934_p2 = por %p933_p1, %p932_p0 }
 0x352   : > { %p928_p13 = pneg %p927_p12 }
 0x354   : > { %p935_p5 = pnand %p934_p2, %p928_p13 }
 0x356   : > { %938 = shalt.err (!%p935_p5)
}
 0x357   : > { %s939_s8 = scalar_lea.hbm %s1188_s5, 512 }
 0x358   : > { %p940_p7 = scmp.ne.s32.totalorder %s1188_s5, %s939_s8  ;;  %p945_p6 = scmp.lt.u32.totalorder %s939_s8, %s1188_s5 }
 0x35a   : > { %p941_p8 = pnand %p940_p7, %p1149_p10 }
 0x35c   : > { %p942_p9 = pneg %p941_p8 }
 0x35e   : > { %p947_p3 = pnand %p945_p6, %p942_p9 }
 0x360   : > { %950 = shalt.err (!%p947_p3)
}
 0x361   : > { %s996_s12 = smov 256   ;;  %s997_s25 = smov 16  }
 0x362   : > { %810 = dma.vmem_to_hbm [thread:$0]  (%p1149_p10), %s655_s26, 512, %s1188_s5, [#allocation9], %s996_s12, %s996_s12, %s997_s25  }
 0x363 PF: > { %p829_p4 = scmp.ge.s32.totalorder %s985_s20, 2  ;;  %p830_p11 = scmp.eq.s32.totalorder %s751_s22, 1 }
 0x365   : > { %p821_p12 = pnand %p830_p11, %p829_p4 }
 0x367   : > { %972 = dma.done.wait (!%p821_p12), [#allocation9], 512  }
 0x368   : > { %974 = vsyncadd (!%p821_p12), [#allocation9], 4294966784  ;;  %s20_s20 = sadd.s32 1, %s985_s20   ;;  %s1198_s18 = smov %s981_s19 }
 0x369   : > { %p17_p13 = scmp.ge.s32.totalorder %s20_s20, 4   ;;  %s1199_s19 = smov %s1201_s23 }
 0x36b   :  { %19 = sbr.rel (!%p17_p13) target bundleno = 5 (0x5), region = 103 }
 0x372   :  { %675 = vsyncpa [#allocation8], 1 }
 0x373   :  { %677 = vsyncpa [#allocation8 + $0x1], 1 }
 0x374   :  { %678 = vsyncpa [#allocation11], 1 }
 0x375   :  { %679 = vsyncpa [#allocation9], 1 }
 0x376   :  { %681 = vsyncpa [#allocation9 + $0x1], 1 }

</bundles_post_ra>
